<compile_context>
chip_gen: v7x
topology: tpu7x:2x2x1
jax: 0.10.0
libtpu: 0.0.40
codegen_flags: <defaults>
</compile_context>

<pallas_src>
import jax
import jax.numpy as jnp
from jax.experimental import pallas as pl
from jax.experimental.pallas import tpu as pltpu

IN_WIDTH = 16          # padded input lane width (13 features + zeros + ones col)
HID_WIDTH = 128        # padded lane width for hidden layers / weights
ONE_IN = IN_WIDTH - 1  # input lane carrying the constant 1.0 (bias column)
ONE_HID = HID_WIDTH - 1
N_LAYERS = 6


def _round_up(x, m):
    return ((x + m - 1) // m) * m


def mlp_kernel(x_ref, w0_ref, w_ref, o_ref):
    """x_ref:  (TILE_B, 16)    bf16  features in lanes 0..12, 1.0 at lane 15
       w0_ref: (16, 128)       bf16  layer-1 weights; bias in row 15; [15,127]=1
       w_ref:  (5, 128, 128)   bf16  layers 2..6; bias in row 127; [k,127,127]=1
       o_ref:  (TILE_B, 1)     f32   prediction"""
    # Layer 1: Linear only (no activation); bias + ones-column propagation via
    # the folded rows of w0.  f32 accumulation on the MXU.
    h = jnp.dot(x_ref[...], w0_ref[...], preferred_element_type=jnp.float32)
    h = h.astype(jnp.bfloat16)                       # bf16 live value between layers

    # Layers 2..5: Linear + ReLU.  Static Python loop -> fully unrolled.
    # ReLU is applied after the bf16 cast (identical result, bf16 VPU width).
    for k in range(N_LAYERS - 2):
        h = jnp.dot(h, w_ref[k], preferred_element_type=jnp.float32)
        h = jnp.maximum(h.astype(jnp.bfloat16), jnp.bfloat16(0.0))

    # Layer 6: Linear + ReLU, kept in f32 for the stored result.
    h = jnp.dot(h, w_ref[N_LAYERS - 2], preferred_element_type=jnp.float32)
    h = jnp.maximum(h, 0.0)

    # Narrow (1-lane) output block: only 4 B/row of HBM writeback.
    o_ref[...] = h[:, :1]


def pack_params(params):
    """Pack [(W (in,out) f32, b (1,out) f32)] * 6 into two bf16 slabs.

    w0_slab (16, 128):      rows 0..12 = W1, row 15 = b1, [15,127] = 1.0
    w_slab  (5, 128, 128):  [k,:in,:out] = W_{k+2}, [k,127,:out] = b_{k+2},
                            [k,127,127] = 1.0 (propagates the ones column)
    """
    w1, b1 = params[0]
    in_d, out_d = w1.shape
    s0 = jnp.zeros((IN_WIDTH, HID_WIDTH), jnp.float32)
    s0 = s0.at[:in_d, :out_d].set(w1)
    s0 = s0.at[ONE_IN, :out_d].set(b1.reshape(-1))
    s0 = s0.at[ONE_IN, ONE_HID].set(1.0)

    slabs = []
    for w, b in params[1:]:
        in_d, out_d = w.shape
        s = jnp.zeros((HID_WIDTH, HID_WIDTH), jnp.float32)
        s = s.at[:in_d, :out_d].set(w)
        s = s.at[ONE_HID, :out_d].set(b.reshape(-1))
        s = s.at[ONE_HID, ONE_HID].set(1.0)
        slabs.append(s)
    return s0.astype(jnp.bfloat16), jnp.stack(slabs).astype(jnp.bfloat16)


def prep_inputs(x, tile_b):
    """(B, 13) f32 -> (round_up(B, tile_b), 16) bf16 with lane 15 == 1.0."""
    b, f = x.shape
    b_pad = _round_up(b, tile_b)
    xp = jnp.zeros((b_pad, IN_WIDTH), jnp.bfloat16)
    xp = xp.at[:b, :f].set(x.astype(jnp.bfloat16))
    xp = xp.at[:, ONE_IN].set(1.0)
    return xp


def mlp_forward(x, w0_slab, w_slab, *, tile_b=2048):
    """x: (B, 13) f32.  Slabs from pack_params.  Returns (B, 1) f32."""
    batch = x.shape[0]

    # Row tile: multiple of 128 (covers f32/bf16 layout rules + MXU rows),
    # capped so large batches always get >= 2 grid steps (v7x dual-TC),
    # and capped at 8192 to keep block VMEM comfortably small everywhere.
    half = _round_up((batch + 1) // 2, 128)
    tile_b = max(128, min(int(tile_b), half, 8192))

    xp = prep_inputs(x, tile_b)
    b_pad = xp.shape[0]
    grid = (b_pad // tile_b,)

    flops = 2 * b_pad * (IN_WIDTH * HID_WIDTH + (N_LAYERS - 1) * HID_WIDTH * HID_WIDTH)
    bytes_accessed = (xp.size * 2            # bf16 input
                      + w0_slab.size * 2 + w_slab.size * 2   # bf16 weights
                      + b_pad * 4)           # f32 output

    out = pl.pallas_call(
        mlp_kernel,
        out_shape=jax.ShapeDtypeStruct((b_pad, 1), jnp.float32),
        grid=grid,
        in_specs=[
            # batch tile of narrow bf16 activations
            pl.BlockSpec((tile_b, IN_WIDTH), lambda i: (i, 0)),
            # packed weights: constant index maps -> resident across grid steps
            pl.BlockSpec((IN_WIDTH, HID_WIDTH), lambda i: (0, 0)),
            pl.BlockSpec((N_LAYERS - 1, HID_WIDTH, HID_WIDTH), lambda i: (0, 0, 0)),
        ],
        # Narrow output block: last dim 1 == full array dim -> legal & cheap.
        out_specs=pl.BlockSpec((tile_b, 1), lambda i: (i, 0)),
        compiler_params=pltpu.CompilerParams(
            # batch grid is embarrassingly parallel -> shards across the two
            # TensorCores on v7x; near no-op on v5e/v6e.
            dimension_semantics=("parallel",),
        ),
        cost_estimate=pl.CostEstimate(
            flops=flops, transcendentals=0, bytes_accessed=bytes_accessed),
    )(xp, w0_slab, w_slab)

    return out[:batch]


def init_params(key, input_size, output_size):
    """Deterministic init mirroring nn.Linear shapes (stored transposed: (in, out))."""
    dims = [input_size, 32, 32, 16, 16, 16, output_size]
    params = []
    for i in range(N_LAYERS):
        fan_in, fan_out = dims[i], dims[i + 1]
        key, kw, kb = jax.random.split(key, 3)
        bound = 1.0 / jnp.sqrt(fan_in)
        w = jax.random.uniform(kw, (fan_in, fan_out), jnp.float32, -bound, bound)
        b = jax.random.uniform(kb, (1, fan_out), jnp.float32, -bound, bound)
        params.append((w, b))
    return params


def reference_forward_f32(x, params):
    """Plain f32 reference of the original forward pass."""
    h = x
    for k, (w, b) in enumerate(params):
        h = h @ w + b
        if k > 0:                      # no activation after layer 1
            h = jnp.maximum(h, 0.0)
    return h


def reference_forward_bf16(x, params):
    """Mirrors the kernel's numerics (bf16 operands/activations, f32 accumulation)."""
    h = x.astype(jnp.bfloat16)
    y = None
    for k, (w, b) in enumerate(params):
        y = jnp.dot(h, w.astype(jnp.bfloat16), preferred_element_type=jnp.float32)
        y = y + b.astype(jnp.bfloat16).astype(jnp.float32)
        if k > 0:
            y = jnp.maximum(y, 0.0)
        h = y.astype(jnp.bfloat16)
    return y


if __name__ == "__main__":
    key = jax.random.PRNGKey(0)

    input_size = 13    # Boston housing feature count
    output_size = 1    # regression target
    batch = 200        # small, but enough to exercise 2 grid steps (tile_b=128)

    key, kx = jax.random.split(key)
    x = jax.random.normal(kx, (batch, input_size), dtype=jnp.float32)

    params = init_params(key, input_size, output_size)
    w0_slab, w_slab = pack_params(params)

    out = mlp_forward(x, w0_slab, w_slab)
    out = jax.block_until_ready(out)
    assert out.shape == (batch, output_size)

    # Tight check against a reference using the same bf16/f32-accum numerics.
    ref_bf16 = reference_forward_bf16(x, params)
    assert jnp.allclose(out, ref_bf16, atol=5e-3, rtol=5e-3), (
        float(jnp.max(jnp.abs(out - ref_bf16))))

    # Loose check against the plain f32 reference (bf16 rounding tolerance).
    ref_f32 = reference_forward_f32(x, params)
    assert jnp.allclose(out, ref_f32, atol=6e-2, rtol=6e-2), (
        float(jnp.max(jnp.abs(out - ref_f32))))

    print("KERNEL_OK")
</pallas_src>

<mosaic_0001>
module attributes {stable_mosaic.version = 11 : i64} {
  func.func @mlp_kernel(%arg0: i32, %arg1: memref<128x16xbf16, #tpu.memory_space<vmem>>, %arg2: memref<16x128xbf16, #tpu.memory_space<vmem>>, %arg3: memref<5x128x128xbf16, #tpu.memory_space<vmem>>, %arg4: memref<128x1xf32, #tpu.memory_space<vmem>>) attributes {dimension_semantics = [#tpu.dimension_semantics<parallel>], iteration_bounds = array<i64: 2>, scalar_prefetch = 0 : i64, scratch_operands = 0 : i64, tpu.core_type = #tpu.core_type<tc>, window_params = [{transform_indices = @transform_0, window_bounds = array<i64: 128, 16>}, {pipeline_mode = #tpu.pipeline_mode<synchronous>, transform_indices = @transform_1, window_bounds = array<i64: 16, 128>}, {pipeline_mode = #tpu.pipeline_mode<synchronous>, transform_indices = @transform_2, window_bounds = array<i64: 5, 128, 128>}, {transform_indices = @transform_3, window_bounds = array<i64: 128, 1>}]} {
    %c0 = arith.constant 0 : index
    %c0_0 = arith.constant 0 : index
    %0 = vector.load %arg1[%c0, %c0_0] : memref<128x16xbf16, #tpu.memory_space<vmem>>, vector<128x16xbf16>
    %c0_1 = arith.constant 0 : index
    %c0_2 = arith.constant 0 : index
    %1 = vector.load %arg2[%c0_1, %c0_2] : memref<16x128xbf16, #tpu.memory_space<vmem>>, vector<16x128xbf16>
    %cst = arith.constant dense<0.000000e+00> : vector<128x128xf32>
    %2 = tpu.matmul %0, %1, %cst {dimension_numbers = #tpu.dot_dimension_numbers<[1], [0], [0], [1], [0, 0, 1, 1], [], []>} : vector<128x16xbf16>, vector<16x128xbf16>, vector<128x128xf32> -> vector<128x128xf32>
    %3 = arith.truncf %2 : vector<128x128xf32> to vector<128x128xbf16>
    %c0_3 = arith.constant 0 : index
    %c0_4 = arith.constant 0 : index
    %c0_5 = arith.constant 0 : index
    %4 = vector.load %arg3[%c0_3, %c0_4, %c0_5] : memref<5x128x128xbf16, #tpu.memory_space<vmem>>, vector<1x128x128xbf16>
    %5 = vector.shape_cast %4 : vector<1x128x128xbf16> to vector<128x128xbf16>
    %cst_6 = arith.constant dense<0.000000e+00> : vector<128x128xf32>
    %6 = tpu.matmul %3, %5, %cst_6 {dimension_numbers = #tpu.dot_dimension_numbers<[1], [0], [0], [1], [0, 0, 1, 1], [], []>} : vector<128x128xbf16>, vector<128x128xbf16>, vector<128x128xf32> -> vector<128x128xf32>
    %7 = arith.truncf %6 : vector<128x128xf32> to vector<128x128xbf16>
    %cst_7 = arith.constant 0.000000e+00 : bf16
    %8 = vector.broadcast %cst_7 : bf16 to vector<128x128xbf16>
    %9 = arith.maximumf %7, %8 : vector<128x128xbf16>
    %c1 = arith.constant 1 : index
    %c0_8 = arith.constant 0 : index
    %c0_9 = arith.constant 0 : index
    %10 = vector.load %arg3[%c1, %c0_8, %c0_9] : memref<5x128x128xbf16, #tpu.memory_space<vmem>>, vector<1x128x128xbf16>
    %11 = vector.shape_cast %10 : vector<1x128x128xbf16> to vector<128x128xbf16>
    %cst_10 = arith.constant dense<0.000000e+00> : vector<128x128xf32>
    %12 = tpu.matmul %9, %11, %cst_10 {dimension_numbers = #tpu.dot_dimension_numbers<[1], [0], [0], [1], [0, 0, 1, 1], [], []>} : vector<128x128xbf16>, vector<128x128xbf16>, vector<128x128xf32> -> vector<128x128xf32>
    %13 = arith.truncf %12 : vector<128x128xf32> to vector<128x128xbf16>
    %cst_11 = arith.constant 0.000000e+00 : bf16
    %14 = vector.broadcast %cst_11 : bf16 to vector<128x128xbf16>
    %15 = arith.maximumf %13, %14 : vector<128x128xbf16>
    %c2 = arith.constant 2 : index
    %c0_12 = arith.constant 0 : index
    %c0_13 = arith.constant 0 : index
    %16 = vector.load %arg3[%c2, %c0_12, %c0_13] : memref<5x128x128xbf16, #tpu.memory_space<vmem>>, vector<1x128x128xbf16>
    %17 = vector.shape_cast %16 : vector<1x128x128xbf16> to vector<128x128xbf16>
    %cst_14 = arith.constant dense<0.000000e+00> : vector<128x128xf32>
    %18 = tpu.matmul %15, %17, %cst_14 {dimension_numbers = #tpu.dot_dimension_numbers<[1], [0], [0], [1], [0, 0, 1, 1], [], []>} : vector<128x128xbf16>, vector<128x128xbf16>, vector<128x128xf32> -> vector<128x128xf32>
    %19 = arith.truncf %18 : vector<128x128xf32> to vector<128x128xbf16>
    %cst_15 = arith.constant 0.000000e+00 : bf16
    %20 = vector.broadcast %cst_15 : bf16 to vector<128x128xbf16>
    %21 = arith.maximumf %19, %20 : vector<128x128xbf16>
    %c3 = arith.constant 3 : index
    %c0_16 = arith.constant 0 : index
    %c0_17 = arith.constant 0 : index
    %22 = vector.load %arg3[%c3, %c0_16, %c0_17] : memref<5x128x128xbf16, #tpu.memory_space<vmem>>, vector<1x128x128xbf16>
    %23 = vector.shape_cast %22 : vector<1x128x128xbf16> to vector<128x128xbf16>
    %cst_18 = arith.constant dense<0.000000e+00> : vector<128x128xf32>
    %24 = tpu.matmul %21, %23, %cst_18 {dimension_numbers = #tpu.dot_dimension_numbers<[1], [0], [0], [1], [0, 0, 1, 1], [], []>} : vector<128x128xbf16>, vector<128x128xbf16>, vector<128x128xf32> -> vector<128x128xf32>
    %25 = arith.truncf %24 : vector<128x128xf32> to vector<128x128xbf16>
    %cst_19 = arith.constant 0.000000e+00 : bf16
    %26 = vector.broadcast %cst_19 : bf16 to vector<128x128xbf16>
    %27 = arith.maximumf %25, %26 : vector<128x128xbf16>
    %c4 = arith.constant 4 : index
    %c0_20 = arith.constant 0 : index
    %c0_21 = arith.constant 0 : index
    %28 = vector.load %arg3[%c4, %c0_20, %c0_21] : memref<5x128x128xbf16, #tpu.memory_space<vmem>>, vector<1x128x128xbf16>
    %29 = vector.shape_cast %28 : vector<1x128x128xbf16> to vector<128x128xbf16>
    %cst_22 = arith.constant dense<0.000000e+00> : vector<128x128xf32>
    %30 = tpu.matmul %27, %29, %cst_22 {dimension_numbers = #tpu.dot_dimension_numbers<[1], [0], [0], [1], [0, 0, 1, 1], [], []>} : vector<128x128xbf16>, vector<128x128xbf16>, vector<128x128xf32> -> vector<128x128xf32>
    %cst_23 = arith.constant 0.000000e+00 : f32
    %31 = vector.broadcast %cst_23 : f32 to vector<128x128xf32>
    %32 = arith.maximumf %30, %31 : vector<128x128xf32>
    %33 = vector.extract_strided_slice %32 {offsets = [0, 0], sizes = [128, 1], strides = [1, 1]} : vector<128x128xf32> to vector<128x1xf32>
    %c0_24 = arith.constant 0 : index
    %c0_25 = arith.constant 0 : index
    %34 = vector.load %arg4[%c0_24, %c0_25] : memref<128x1xf32, #tpu.memory_space<vmem>>, vector<128x1xf32>
    tpu.vector_store %arg4[%c0_24, %c0_25], %33 {strides = array<i32>} : memref<128x1xf32, #tpu.memory_space<vmem>>, vector<128x1xf32>,
    return
  }
  func.func @transform_0(%arg0: i32) -> (i32, i32) {
    %c0_i32 = arith.constant 0 : i32
    %c0_i32_0 = arith.constant 0 : i32
    return %arg0, %c0_i32 : i32, i32
  }
  func.func @transform_1(%arg0: i32) -> (i32, i32) {
    %c0_i32 = arith.constant 0 : i32
    %c0_i32_0 = arith.constant 0 : i32
    %c0_i32_1 = arith.constant 0 : i32
    return %c0_i32, %c0_i32_0 : i32, i32
  }
  func.func @transform_2(%arg0: i32) -> (i32, i32, i32) {
    %c0_i32 = arith.constant 0 : i32
    %c0_i32_0 = arith.constant 0 : i32
    %c0_i32_1 = arith.constant 0 : i32
    %c0_i32_2 = arith.constant 0 : i32
    return %c0_i32, %c0_i32_0, %c0_i32_1 : i32, i32, i32
  }
  func.func @transform_3(%arg0: i32) -> (i32, i32) {
    %c0_i32 = arith.constant 0 : i32
    %c0_i32_0 = arith.constant 0 : i32
    return %arg0, %c0_i32 : i32, i32
  }
}

</mosaic_0001>

<bundles_post_ra>
// kernel: tpu_custom_call.1
= control target key start
LH: loop header
LB: loop body
LE: loop exit
PB: predicated region body
PF: predicated region fallthrough
CT: control target
= control target key end

     0   :  { %8 = vsyncpa [#allocation3], 0  ;;  %s1846_s12 = smov 0   ;;  %s1996_s0 = inlined_call_operand.vmem [shape: bf16[256,16], index: 0, kind: input, shape index: {}]   ;;  %s1997_s1 = inlined_call_operand.vmem [shape: bf16[16,128], index: 1, kind: input, shape index: {}]   ;;  %s1998_s2 = inlined_call_operand.hbm [shape: bf16[5,128,128], index: 2, kind: input, shape index: {}]   ;;  %s1999_s3 = inlined_call_operand.vmem [shape: f32[256,1], index: 3, kind: output, shape index: {}]  }
   0x1 LB: > { %s1358_s13 = sadd.s32 4294967295, %s1820_s12   ;;  %p1360_p0 = scmp.ge.s32.totalorder %s1820_s12, 1  ;;  %s1820_s12 = sphi %s1846_s12, %s14_s12  }
   0x2   : > { %p113_p1 = scmp.lt.s32.totalorder %s1820_s12, 3  ;;  %s1822_s14 = smov [#allocation2]  }
   0x3   : > { %s128_s15 = sshll.u32 %s1822_s14, 4  ;;  %p1860_p3 = scmp.eq.s32.totalorder %s1358_s13, 0  ;;  %s129_s15 = int_to_ptr.vmem [resolvable:$true] %s128_s15 }
   0x4   : > { %p1854_p2 = pnand %p1360_p0, %p113_p1  ;;  %s1782_s21 = scalar_lea.hbm %s1998_s2, 5120 }
   0x5   : > { %s2004_s17 = scalar_select %p1860_p3, 1, 0 }
   0x6   : > { %s2003_s16 = scalar_select %p1854_p2, 1, 0 }
   0x7   : > { %p1715_p4 = pneg %p1854_p2  ;;  %p1783_p6 = scmp.ne.s32.totalorder %s1998_s2, %s1782_s21 }
   0x8   : > { %p1789_p10 = scmp.lt.u32.totalorder %s1782_s21, %s1998_s2 }
   0x9   : > { %p1868_p5 = pnand %p1860_p3, %p1715_p4 }
   0xb   : > { %p1784_p7 = pneg %p1868_p5 }
   0xd   : > { %p1785_p8 = pnand %p1784_p7, %p1783_p6 }
   0xf   : > { %p1786_p9 = pneg %p1785_p8 }
  0x11   : > { %p1791_p11 = pnand %p1789_p10, %p1786_p9 }
  0x13   : > { %1794 = shalt.err (!%p1791_p11)
}
  0x14   : > { %s1795_s26 = scalar_lea.vmem %s129_s15, 5120  ;;  %p1803_p1 = scmp.lt.s32.totalorder %s129_s15, %s129_s15 }
  0x15   : > { %p1796_p12 = scmp.ne.s32.totalorder %s129_s15, %s1795_s26  ;;  %p1804_p4 = scmp.lt.s32.totalorder %s1795_s26, %s1795_s26 }
  0x17   : > { %p1798_p13 = pnand %p1796_p12, %p1784_p7  ;;  %p1805_p3 = por %p1804_p4, %p1803_p1 }
  0x19   : > { %p1799_p0 = pneg %p1798_p13 }
  0x1b   : > { %p1806_p2 = pnand %p1805_p3, %p1799_p0 }
  0x1d   : > { %1809 = shalt.err (!%p1806_p2)
}
  0x1e   : > { %s1823_s27 = smov 64   ;;  %s1824_s28 = smov 4  }
  0x1f   : > { %1718 = dma.hbm_to_vmem [thread:$0]  (!%p1868_p5), %s1998_s2, 5120, %s129_s15, [#allocation3], %s1823_s27, %s1823_s27, %s1824_s28  }
  0x20   : > { %p2006_p6 = scmp.ne.s32.totalorder %s2003_s16, 0 }
  0x21   : > { %p2007_p8 = scmp.ne.s32.totalorder (!%p2006_p6), %s2004_s17, 0 }
  0x22   : > { %153 = sbr.rel (%p2006_p6) target bundleno = 1390 (0x56e), region = 32 }
  0x29   : > { %1815 = dma.done.wait (%p2007_p8), [#allocation3], 5120  }
  0x2a   : > { %1817 = vsyncadd (%p2007_p8), [#allocation3], 4294962176  ;;  %s1365_s4 = sshll.u32 %s1358_s13, 4  ;;  %v1733_v0 = vld [vmem:[%s1997_s1] sm:$0xff]   ;;  %vm254_vm0 = vcmask 130048   ;;  %v1743_v6 = vld [vmem:[#allocation2 + $0x8] sm:$0xff]  }
  0x2b   : > { %p178_p2 = scmp.lt.s32.totalorder %s1365_s4, 31  ;;  %1517 = vmatprep.subr.bf16.mxu0 %v1733_v0  ;;  %v1742_v5 = vld [vmem:[#allocation2] sm:$0xff]   ;;  %v1744_v8 = vld [vmem:[#allocation2 + $0x10] sm:$0xff]   ;;  %v1745_v9 = vld [vmem:[#allocation2 + $0x18] sm:$0xff]   ;;  %v1825_v61 = vmov 0   ;;  %vm1273_vm1 = vcmask 7168  }
  0x2c   : > { %1518 = vmatpush3.bf16.msra.mxu0 %v1733_v0  ;;  %1535 = vmatprep.subr.bf16.mxu1 %v1742_v5  ;;  %v1746_v12 = vld [vmem:[#allocation2 + $0x20] sm:$0xff]   ;;  %v1747_v13 = vld [vmem:[#allocation2 + $0x28] sm:$0xff]   ;;  %v1748_v15 = vld [vmem:[#allocation2 + $0x30] sm:$0xff]  }
  0x2d   : > { %s2009_s4 = smov (!%p178_p2, %s1365_s4), 31  ;;  %1536 = vmatpush3.bf16.msra.mxu1 %v1742_v5  ;;  %v1749_v16 = vld [vmem:[#allocation2 + $0x38] sm:$0xff]   ;;  %v1750_v17 = vld [vmem:[#allocation2 + $0x40] sm:$0xff]   ;;  %v1751_v18 = vld [vmem:[#allocation2 + $0x48] sm:$0xff]  }
  0x2e   : > { %s1366_s5 = sshll.u32 %s2009_s4, 2  ;;  %1537 = vmatprep.subr.bf16.mxu1 %v1743_v6  ;;  %1567 = vmatprep.subr.bf16.mxu0 %v1750_v17  ;;  %v1752_v19 = vld [vmem:[#allocation2 + $0x50] sm:$0xff]   ;;  %v1753_v20 = vld [vmem:[#allocation2 + $0x58] sm:$0xff]   ;;  %v1754_v21 = vld [vmem:[#allocation2 + $0x60] sm:$0xff]   ;;  %s1368_s11 = sshll.u32 %s2009_s4, 3 }
  0x2f   : > { %s1902_s8 = scalar_lea.vmem %s1996_s0, %s1366_s5  ;;  %v1755_v22 = vld [vmem:[#allocation2 + $0x68] sm:$0xff]   ;;  %v1756_v47 = vld [vmem:[#allocation2 + $0x70] sm:$0xff]   ;;  %v1757_v48 = vld [vmem:[#allocation2 + $0x78] sm:$0xff]   ;;  %s1959_s15 = scalar_lea.vmem %s1999_s3, %s1368_s11 }
  0x30   : > { %v1734_v1 = vld [vmem:[%s1902_s8] sm:$0xff]   ;;  %v1735_v2 = vld [vmem:[%s1902_s8 + $0x8] sm:$0xff]   ;;  %v1736_v3 = vld [vmem:[%s1902_s8 + $0x10] sm:$0xff]  }
  0x31   : > { %1519 = vmatprep.mubr.msk.bf16.mxu0 %vm254_vm0, %v1734_v1  ;;  %v1737_v4 = vld [vmem:[%s1902_s8 + $0x18] sm:$0xff]   ;;  %v1738_v7 = vld [vmem:[%s1902_s8 + $0x20] sm:$0xff]   ;;  %v1739_v10 = vld [vmem:[%s1902_s8 + $0x28] sm:$0xff]   ;;  %1538 = vmatpush3.bf16.msra.mxu1 %v1743_v6 }
  0x32   : > { %1520 = vmatmul.mubr.msk.bf16.vlgmr.msra.gmra.mrb[0].mxu0 %vm254_vm0, %v1735_v2  ;;  %v1740_v11 = vld [vmem:[%s1902_s8 + $0x30] sm:$0xff]   ;;  %1539 = vmatprep.subr.bf16.mxu1 %v1744_v8  ;;  %v1741_v14 = vld [vmem:[%s1902_s8 + $0x38] sm:$0xff]   ;;  %v1758_v49 = vld [vmem:[#allocation2 + $0x80] sm:$0xff]  }
  0x33   : > { %1523 = vmatprep.mubr.msk.bf16.mxu0 %vm254_vm0, %v1736_v3  ;;  %1568 = vmatpush3.bf16.msra.mxu0 %v1750_v17  ;;  %v1759_v50 = vld [vmem:[#allocation2 + $0x88] sm:$0xff]   ;;  %v1760_v51 = vld [vmem:[#allocation2 + $0x90] sm:$0xff]   ;;  %v1761_v52 = vld [vmem:[#allocation2 + $0x98] sm:$0xff]  }
  0x34   : > { %1569 = vmatprep.subr.bf16.mxu0 %v1751_v18  ;;  %v1762_v53 = vld [vmem:[#allocation2 + $0xa0] sm:$0xff]   ;;  %v1763_v54 = vld [vmem:[#allocation2 + $0xa8] sm:$0xff]  }
  0x35   : > { %1540 = vmatpush3.bf16.msra.mxu1 %v1744_v8 }
  0x36   : > { %1541 = vmatprep.subr.bf16.mxu1 %v1745_v9 }
  0x37   : > { %1570 = vmatpush3.bf16.msra.mxu0 %v1751_v18 }
  0x38   : > { %1571 = vmatprep.subr.bf16.mxu0 %v1752_v19 }
  0x39   : > { %1542 = vmatpush3.bf16.msra.mxu1 %v1745_v9 }
  0x3a   : > { %1524 = vmatmul.mubr.msk.bf16.gmra.mrb[4].mxu0 %vm254_vm0, %v1737_v4  ;;  %1543 = vmatprep.subr.bf16.mxu1 %v1746_v12 }
  0x3b   : > { %1527 = vmatprep.mubr.msk.bf16.mxu0 %vm254_vm0, %v1738_v7  ;;  %1572 = vmatpush3.bf16.msra.mxu0 %v1752_v19 }
  0x3c   : > { %1573 = vmatprep.subr.bf16.mxu0 %v1753_v20 }
  0x3d   : > { %1544 = vmatpush3.bf16.msra.mxu1 %v1746_v12 }
  0x3e   : > { %1545 = vmatprep.subr.bf16.mxu1 %v1747_v13 }
  0x3f   : > { %1574 = vmatpush3.bf16.msra.mxu0 %v1753_v20 }
  0x40   : > { %1575 = vmatprep.subr.bf16.mxu0 %v1754_v21 }
  0x41   : > { %1546 = vmatpush3.bf16.msra.mxu1 %v1747_v13 }
  0x42   : > { %1528 = vmatmul.mubr.msk.bf16.gmra.mrb[8].mxu0 %vm254_vm0, %v1739_v10  ;;  %1547 = vmatprep.subr.bf16.mxu1 %v1748_v15 }
  0x43   : > { %1531 = vmatprep.mubr.msk.bf16.mxu0 %vm254_vm0, %v1740_v11  ;;  %1576 = vmatpush3.bf16.msra.mxu0 %v1754_v21 }
  0x44   : > { %1577 = vmatprep.subr.bf16.mxu0 %v1755_v22 }
  0x45   : > { %1548 = vmatpush3.bf16.msra.mxu1 %v1748_v15 }
  0x46   : > { %1549 = vmatprep.subr.bf16.mxu1 %v1749_v16 }
  0x47   : > { %1578 = vmatpush3.bf16.msra.mxu0 %v1755_v22 }
  0x48   : > { %1579 = vmatprep.subr.bf16.mxu0 %v1756_v47 }
  0x49   : > { %1550 = vmatpush3.bf16.msra.mxu1 %v1749_v16 }
  0x4a   : > { %1532 = vmatmul.mubr.msk.bf16.gmra.mrb[12].mxu0 %vm254_vm0, %v1741_v14  ;;  %1599 = vmatprep.subr.bf16.mxu1 %v1758_v49 }
  0x4b   : > { %1580 = vmatpush3.bf16.msra.mxu0 %v1756_v47 }
  0x4c   : > { %1581 = vmatprep.subr.bf16.mxu0 %v1757_v48 }
  0x4f   : > { %1582 = vmatpush3.bf16.msra.mxu0 %v1757_v48 }
 0x105   : > { %v1521_v23 = vpop.f32.mrb[0].mxu0 }
 0x106   : > { %v313_v24 = vpop.f32.mrb[1].mxu0 }
 0x107   : > { %v1522_v25 = vpop.f32.mrb[2].mxu0 }
 0x108   : > { %v377_v26 = vpack.c.bf16 %v1522_v25, %v1521_v23  ;;  %v316_v27 = vpop.f32.mrb[3].mxu0  ;;  %v1765_v25 = vld [vmem:[#allocation2 + $0xb8] sm:$0xff]  }
 0x109   : > { %v376_v28 = vpack.c.bf16 %v316_v27, %v313_v24  ;;  %v1764_v24 = vld [vmem:[#allocation2 + $0xb0] sm:$0xff]   ;;  %v1767_v27 = vld [vmem:[#allocation2 + $0xc8] sm:$0xff]  }
 0x10b   : > { %1551 = vmatprep.mubr.bf16.mxu1 %v376_v28  ;;  %v1768_v28 = vld [vmem:[#allocation2 + $0xd0] sm:$0xff]  }
 0x10c   : > { %1552 = vmatmul.mubr.bf16.vlgmr.msra.gmra.mrb[0].mxu1 %v377_v26  ;;  %v1766_v26 = vld [vmem:[#allocation2 + $0xc0] sm:$0xff]  }
 0x10d   : > { %v1525_v29 = vpop.f32.mrb[4].mxu0  ;;  %1600 = vmatpush3.bf16.msra.mxu1 %v1758_v49  ;;  %1631 = vmatprep.subr.bf16.mxu0 %v1766_v26 }
 0x10e   : > { %v329_v30 = vpop.f32.mrb[5].mxu0  ;;  %1601 = vmatprep.subr.bf16.mxu1 %v1759_v50 }
 0x10f   : > { %v1526_v31 = vpop.f32.mrb[6].mxu0 }
 0x110   : > { %v379_v32 = vpack.c.bf16 %v1526_v31, %v1525_v29  ;;  %v332_v33 = vpop.f32.mrb[7].mxu0  ;;  %v1769_v29 = vld [vmem:[#allocation2 + $0xd8] sm:$0xff]   ;;  %v1771_v31 = vld [vmem:[#allocation2 + $0xe8] sm:$0xff]  }
 0x111   : > { %v378_v34 = vpack.c.bf16 %v332_v33, %v329_v30  ;;  %1602 = vmatpush3.bf16.msra.mxu1 %v1759_v50  ;;  %v1770_v30 = vld [vmem:[#allocation2 + $0xe0] sm:$0xff]  }
 0x112   : > { %1603 = vmatprep.subr.bf16.mxu1 %v1760_v51 }
 0x113   : > { %1555 = vmatprep.mubr.bf16.mxu1 %v378_v34 }
 0x114   : > { %1556 = vmatmul.mubr.bf16.gmra.mrb[4].mxu1 %v379_v32 }
 0x115   : > { %v1529_v35 = vpop.f32.mrb[8].mxu0  ;;  %1604 = vmatpush3.bf16.msra.mxu1 %v1760_v51 }
 0x116   : > { %v345_v36 = vpop.f32.mrb[9].mxu0  ;;  %1605 = vmatprep.subr.bf16.mxu1 %v1761_v52 }
 0x117   : > { %v1530_v37 = vpop.f32.mrb[10].mxu0 }
 0x118   : > { %v381_v38 = vpack.c.bf16 %v1530_v37, %v1529_v35  ;;  %v348_v39 = vpop.f32.mrb[11].mxu0 }
 0x119   : > { %v380_v40 = vpack.c.bf16 %v348_v39, %v345_v36  ;;  %1606 = vmatpush3.bf16.msra.mxu1 %v1761_v52 }
 0x11a   : > { %1607 = vmatprep.subr.bf16.mxu1 %v1762_v53 }
 0x11b   : > { %1559 = vmatprep.mubr.bf16.mxu1 %v380_v40 }
 0x11c   : > { %1560 = vmatmul.mubr.bf16.gmra.mrb[8].mxu1 %v381_v38 }
 0x11d   : > { %v1533_v41 = vpop.f32.mrb[12].mxu0  ;;  %1608 = vmatpush3.bf16.msra.mxu1 %v1762_v53 }
 0x11e   : > { %v361_v42 = vpop.f32.mrb[13].mxu0  ;;  %1609 = vmatprep.subr.bf16.mxu1 %v1763_v54 }
 0x11f   : > { %v1534_v43 = vpop.f32.mrb[14].mxu0 }
 0x120   : > { %v383_v44 = vpack.c.bf16 %v1534_v43, %v1533_v41  ;;  %v364_v45 = vpop.f32.mrb[15].mxu0 }
 0x121   : > { %v382_v46 = vpack.c.bf16 %v364_v45, %v361_v42  ;;  %1610 = vmatpush3.bf16.msra.mxu1 %v1763_v54 }
 0x122   : > { %1611 = vmatprep.subr.bf16.mxu1 %v1764_v24 }
 0x123   : > { %1563 = vmatprep.mubr.bf16.mxu1 %v382_v46 }
 0x124   : > { %1564 = vmatmul.mubr.bf16.gmra.mrb[12].mxu1 %v383_v44 }
 0x125   : > { %1612 = vmatpush3.bf16.msra.mxu1 %v1764_v24 }
 0x126   : > { %1613 = vmatprep.subr.bf16.mxu1 %v1765_v25 }
 0x129   : > { %1614 = vmatpush3.bf16.msra.mxu1 %v1765_v25 }
 0x1df   : > { %v1553_v55 = vpop.f32.mrb[0].mxu1 }
 0x1e0   : > { %v482_v56 = vpop.f32.mrb[1].mxu1 }
 0x1e1   : > { %v1554_v57 = vpop.f32.mrb[2].mxu1 }
 0x1e2   : > { %v546_v58 = vpack.c.bf16 %v1554_v57, %v1553_v55  ;;  %v485_v59 = vpop.f32.mrb[3].mxu1 }
 0x1e3   : > { %v545_v60 = vpack.c.bf16 %v485_v59, %v482_v56 }
 0x1e4   : > { %v554_v63 = vmax.bf16 %v1825_v61, %v546_v58 }
 0x1e5   : > { %v553_v62 = vmax.bf16 %v1825_v61, %v545_v60 }
 0x1e7   : > { %v1557_v0 = vpop.f32.mrb[4].mxu1  ;;  %1583 = vmatprep.mubr.bf16.mxu0 %v553_v62 }
 0x1e8   : > { %v498_v1 = vpop.f32.mrb[5].mxu1  ;;  %1584 = vmatmul.mubr.bf16.vlgmr.msra.gmra.mrb[16].mxu0 %v554_v63 }
 0x1e9   : > { %v1558_v2 = vpop.f32.mrb[6].mxu1  ;;  %1632 = vmatpush3.bf16.msra.mxu0 %v1766_v26 }
 0x1ea   : > { %v548_v3 = vpack.c.bf16 %v1558_v2, %v1557_v0  ;;  %v501_v4 = vpop.f32.mrb[7].mxu1  ;;  %1633 = vmatprep.subr.bf16.mxu0 %v1767_v27  ;;  %v1773_v2 = vld [vmem:[#allocation2 + $0xf8] sm:$0xff]  }
 0x1eb   : > { %v547_v5 = vpack.c.bf16 %v501_v4, %v498_v1  ;;  %v1772_v1 = vld [vmem:[#allocation2 + $0xf0] sm:$0xff]   ;;  %v1775_v4 = vld [vmem:[#allocation2 + $0x108] sm:$0xff]  }
 0x1ec   : > { %v556_v7 = vmax.bf16 %v1825_v61, %v548_v3  ;;  %v1774_v3 = vld [vmem:[#allocation2 + $0x100] sm:$0xff]  }
 0x1ed   : > { %v555_v6 = vmax.bf16 %v1825_v61, %v547_v5  ;;  %1634 = vmatpush3.bf16.msra.mxu0 %v1767_v27  ;;  %1695 = vmatprep.subr.bf16.mxu1 %v1774_v3  ;;  %v1776_v5 = vld [vmem:[#allocation2 + $0x110] sm:$0xff]  }
 0x1ee   : > { %1635 = vmatprep.subr.bf16.mxu0 %v1768_v28 }
 0x1ef   : > { %v1561_v8 = vpop.f32.mrb[8].mxu1  ;;  %1587 = vmatprep.mubr.bf16.mxu0 %v555_v6  ;;  %v1777_v6 = vld [vmem:[#allocation2 + $0x118] sm:$0xff]  }
 0x1f0   : > { %v514_v9 = vpop.f32.mrb[9].mxu1  ;;  %1588 = vmatmul.mubr.bf16.gmra.mrb[20].mxu0 %v556_v7  ;;  %v1778_v7 = vld [vmem:[#allocation2 + $0x120] sm:$0xff]  }
 0x1f1   : > { %v1562_v10 = vpop.f32.mrb[10].mxu1  ;;  %1636 = vmatpush3.bf16.msra.mxu0 %v1768_v28 }
 0x1f2   : > { %v550_v11 = vpack.c.bf16 %v1562_v10, %v1561_v8  ;;  %v517_v12 = vpop.f32.mrb[11].mxu1  ;;  %1637 = vmatprep.subr.bf16.mxu0 %v1769_v29  ;;  %v1779_v8 = vld [vmem:[#allocation2 + $0x128] sm:$0xff]  }
 0x1f3   : > { %v549_v13 = vpack.c.bf16 %v517_v12, %v514_v9 }
 0x1f4   : > { %v558_v15 = vmax.bf16 %v1825_v61, %v550_v11 }
 0x1f5   : > { %v557_v14 = vmax.bf16 %v1825_v61, %v549_v13  ;;  %1638 = vmatpush3.bf16.msra.mxu0 %v1769_v29 }
 0x1f6   : > { %1639 = vmatprep.subr.bf16.mxu0 %v1770_v30 }
 0x1f7   : > { %v1565_v16 = vpop.f32.mrb[12].mxu1  ;;  %1591 = vmatprep.mubr.bf16.mxu0 %v557_v14 }
 0x1f8   : > { %v530_v17 = vpop.f32.mrb[13].mxu1  ;;  %1592 = vmatmul.mubr.bf16.gmra.mrb[24].mxu0 %v558_v15 }
 0x1f9   : > { %v1566_v18 = vpop.f32.mrb[14].mxu1  ;;  %1640 = vmatpush3.bf16.msra.mxu0 %v1770_v30 }
 0x1fa   : > { %v552_v19 = vpack.c.bf16 %v1566_v18, %v1565_v16  ;;  %v533_v20 = vpop.f32.mrb[15].mxu1  ;;  %1641 = vmatprep.subr.bf16.mxu0 %v1771_v31 }
 0x1fb   : > { %v551_v21 = vpack.c.bf16 %v533_v20, %v530_v17 }
 0x1fc   : > { %v560_v23 = vmax.bf16 %v1825_v61, %v552_v19 }
 0x1fd   : > { %v559_v22 = vmax.bf16 %v1825_v61, %v551_v21  ;;  %1642 = vmatpush3.bf16.msra.mxu0 %v1771_v31 }
 0x1fe   : > { %1643 = vmatprep.subr.bf16.mxu0 %v1772_v1 }
 0x1ff   : > { %1595 = vmatprep.mubr.bf16.mxu0 %v559_v22 }
 0x200   : > { %1596 = vmatmul.mubr.bf16.gmra.mrb[28].mxu0 %v560_v23 }
 0x201   : > { %1644 = vmatpush3.bf16.msra.mxu0 %v1772_v1 }
 0x202   : > { %1645 = vmatprep.subr.bf16.mxu0 %v1773_v2 }
 0x205   : > { %1646 = vmatpush3.bf16.msra.mxu0 %v1773_v2 }
 0x206   : > { %1663 = vmatprep.subr.bf16.mxu0 %v1774_v3 }
 0x2bb   : > { %v1585_v32 = vpop.f32.mrb[16].mxu0 }
 0x2bc   : > { %v660_v33 = vpop.f32.mrb[17].mxu0 }
 0x2bd   : > { %v1586_v34 = vpop.f32.mrb[18].mxu0 }
 0x2be   : > { %v724_v35 = vpack.c.bf16 %v1586_v34, %v1585_v32  ;;  %v663_v36 = vpop.f32.mrb[19].mxu0 }
 0x2bf   : > { %v723_v37 = vpack.c.bf16 %v663_v36, %v660_v33 }
 0x2c0   : > { %v732_v39 = vmax.bf16 %v1825_v61, %v724_v35 }
 0x2c1   : > { %v731_v38 = vmax.bf16 %v1825_v61, %v723_v37 }
 0x2c3   : > { %v1589_v40 = vpop.f32.mrb[20].mxu0  ;;  %1615 = vmatprep.mubr.bf16.mxu1 %v731_v38 }
 0x2c4   : > { %v676_v41 = vpop.f32.mrb[21].mxu0  ;;  %1616 = vmatmul.mubr.bf16.vlgmr.msra.gmra.mrb[16].mxu1 %v732_v39 }
 0x2c5   : > { %v1590_v42 = vpop.f32.mrb[22].mxu0  ;;  %1703 = vmatpush3.bf16.msra.mxu1 %v1774_v3 }
 0x2c6   : > { %v726_v43 = vpack.c.bf16 %v1590_v42, %v1589_v40  ;;  %v679_v44 = vpop.f32.mrb[23].mxu0  ;;  %1696 = vmatprep.subr.bf16.mxu1 %v1775_v4  ;;  %v1781_v42 = vld [vmem:[#allocation2 + $0x138] sm:$0xff]  }
 0x2c7   : > { %v725_v45 = vpack.c.bf16 %v679_v44, %v676_v41  ;;  %v1780_v41 = vld [vmem:[#allocation2 + $0x130] sm:$0xff]  }
 0x2c8   : > { %v734_v47 = vmax.bf16 %v1825_v61, %v726_v43 }
 0x2c9   : > { %v733_v46 = vmax.bf16 %v1825_v61, %v725_v45  ;;  %1704 = vmatpush3.bf16.msra.mxu1 %v1775_v4 }
 0x2ca   : > { %1697 = vmatprep.subr.bf16.mxu1 %v1776_v5 }
 0x2cb   : > { %v1593_v48 = vpop.f32.mrb[24].mxu0  ;;  %1619 = vmatprep.mubr.bf16.mxu1 %v733_v46 }
 0x2cc   : > { %v692_v49 = vpop.f32.mrb[25].mxu0  ;;  %1620 = vmatmul.mubr.bf16.gmra.mrb[20].mxu1 %v734_v47 }
 0x2cd   : > { %v1594_v50 = vpop.f32.mrb[26].mxu0  ;;  %1705 = vmatpush3.bf16.msra.mxu1 %v1776_v5 }
 0x2ce   : > { %v728_v51 = vpack.c.bf16 %v1594_v50, %v1593_v48  ;;  %v695_v52 = vpop.f32.mrb[27].mxu0  ;;  %1698 = vmatprep.subr.bf16.mxu1 %v1777_v6 }
 0x2cf   : > { %v727_v53 = vpack.c.bf16 %v695_v52, %v692_v49 }
 0x2d0   : > { %v736_v55 = vmax.bf16 %v1825_v61, %v728_v51 }
 0x2d1   : > { %v735_v54 = vmax.bf16 %v1825_v61, %v727_v53  ;;  %1706 = vmatpush3.bf16.msra.mxu1 %v1777_v6 }
 0x2d2   : > { %1699 = vmatprep.subr.bf16.mxu1 %v1778_v7 }
 0x2d3   : > { %v1597_v56 = vpop.f32.mrb[28].mxu0  ;;  %1623 = vmatprep.mubr.bf16.mxu1 %v735_v54 }
 0x2d4   : > { %v708_v57 = vpop.f32.mrb[29].mxu0  ;;  %1624 = vmatmul.mubr.bf16.gmra.mrb[24].mxu1 %v736_v55 }
 0x2d5   : > { %v1598_v58 = vpop.f32.mrb[30].mxu0  ;;  %1707 = vmatpush3.bf16.msra.mxu1 %v1778_v7 }
 0x2d6   : > { %v730_v59 = vpack.c.bf16 %v1598_v58, %v1597_v56  ;;  %v711_v60 = vpop.f32.mrb[31].mxu0  ;;  %1700 = vmatprep.subr.bf16.mxu1 %v1779_v8 }
 0x2d7   : > { %v729_v62 = vpack.c.bf16 %v711_v60, %v708_v57 }
 0x2d8   : > { %v738_v0 = vmax.bf16 %v1825_v61, %v730_v59 }
 0x2d9   : > { %v737_v63 = vmax.bf16 %v1825_v61, %v729_v62  ;;  %1708 = vmatpush3.bf16.msra.mxu1 %v1779_v8 }
 0x2da   : > { %1701 = vmatprep.subr.bf16.mxu1 %v1780_v41 }
 0x2db   : > { %1627 = vmatprep.mubr.bf16.mxu1 %v737_v63 }
 0x2dc   : > { %1628 = vmatmul.mubr.bf16.gmra.mrb[28].mxu1 %v738_v0 }
 0x2dd   : > { %1709 = vmatpush3.bf16.msra.mxu1 %v1780_v41 }
 0x2de   : > { %1702 = vmatprep.subr.bf16.mxu1 %v1781_v42 }
 0x2e1   : > { %1710 = vmatpush3.bf16.msra.mxu1 %v1781_v42 }
 0x397   : > { %v1617_v9 = vpop.f32.mrb[16].mxu1 }
 0x398   : > { %v838_v10 = vpop.f32.mrb[17].mxu1 }
 0x399   : > { %v1618_v11 = vpop.f32.mrb[18].mxu1 }
 0x39a   : > { %v902_v12 = vpack.c.bf16 %v1618_v11, %v1617_v9  ;;  %v841_v13 = vpop.f32.mrb[19].mxu1 }
 0x39b   : > { %v901_v14 = vpack.c.bf16 %v841_v13, %v838_v10 }
 0x39c   : > { %v910_v16 = vmax.bf16 %v1825_v61, %v902_v12 }
 0x39d   : > { %v909_v15 = vmax.bf16 %v1825_v61, %v901_v14 }
 0x39f   : > { %v1621_v17 = vpop.f32.mrb[20].mxu1  ;;  %1647 = vmatprep.mubr.bf16.mxu0 %v909_v15 }
 0x3a0   : > { %v854_v18 = vpop.f32.mrb[21].mxu1  ;;  %1648 = vmatmul.mubr.bf16.vlgmr.msra.gmra.mrb[32].mxu0 %v910_v16 }
 0x3a1   : > { %v1622_v19 = vpop.f32.mrb[22].mxu1  ;;  %1664 = vmatpush3.bf16.msra.mxu0 %v1774_v3 }
 0x3a2   : > { %v904_v20 = vpack.c.bf16 %v1622_v19, %v1621_v17  ;;  %v857_v21 = vpop.f32.mrb[23].mxu1  ;;  %1665 = vmatprep.subr.bf16.mxu0 %v1775_v4 }
 0x3a3   : > { %v903_v22 = vpack.c.bf16 %v857_v21, %v854_v18 }
 0x3a4   : > { %v912_v24 = vmax.bf16 %v1825_v61, %v904_v20 }
 0x3a5   : > { %v911_v23 = vmax.bf16 %v1825_v61, %v903_v22  ;;  %1666 = vmatpush3.bf16.msra.mxu0 %v1775_v4 }
 0x3a6   : > { %1667 = vmatprep.subr.bf16.mxu0 %v1776_v5 }
 0x3a7   : > { %v1625_v25 = vpop.f32.mrb[24].mxu1  ;;  %1651 = vmatprep.mubr.bf16.mxu0 %v911_v23 }
 0x3a8   : > { %v870_v26 = vpop.f32.mrb[25].mxu1  ;;  %1652 = vmatmul.mubr.bf16.gmra.mrb[36].mxu0 %v912_v24 }
 0x3a9   : > { %v1626_v27 = vpop.f32.mrb[26].mxu1  ;;  %1668 = vmatpush3.bf16.msra.mxu0 %v1776_v5 }
 0x3aa   : > { %v906_v28 = vpack.c.bf16 %v1626_v27, %v1625_v25  ;;  %v873_v29 = vpop.f32.mrb[27].mxu1  ;;  %1669 = vmatprep.subr.bf16.mxu0 %v1777_v6 }
 0x3ab   : > { %v905_v30 = vpack.c.bf16 %v873_v29, %v870_v26 }
 0x3ac   : > { %v914_v32 = vmax.bf16 %v1825_v61, %v906_v28 }
 0x3ad   : > { %v913_v31 = vmax.bf16 %v1825_v61, %v905_v30  ;;  %1670 = vmatpush3.bf16.msra.mxu0 %v1777_v6 }
 0x3ae   : > { %1671 = vmatprep.subr.bf16.mxu0 %v1778_v7 }
 0x3af   : > { %v1629_v33 = vpop.f32.mrb[28].mxu1  ;;  %1655 = vmatprep.mubr.bf16.mxu0 %v913_v31 }
 0x3b0   : > { %v886_v34 = vpop.f32.mrb[29].mxu1  ;;  %1656 = vmatmul.mubr.bf16.gmra.mrb[40].mxu0 %v914_v32 }
 0x3b1   : > { %v1630_v35 = vpop.f32.mrb[30].mxu1  ;;  %1672 = vmatpush3.bf16.msra.mxu0 %v1778_v7 }
 0x3b2   : > { %v908_v36 = vpack.c.bf16 %v1630_v35, %v1629_v33  ;;  %v889_v37 = vpop.f32.mrb[31].mxu1  ;;  %1673 = vmatprep.subr.bf16.mxu0 %v1779_v8 }
 0x3b3   : > { %v907_v38 = vpack.c.bf16 %v889_v37, %v886_v34 }
 0x3b4   : > { %v916_v40 = vmax.bf16 %v1825_v61, %v908_v36 }
 0x3b5   : > { %v915_v39 = vmax.bf16 %v1825_v61, %v907_v38  ;;  %1674 = vmatpush3.bf16.msra.mxu0 %v1779_v8 }
 0x3b6   : > { %1675 = vmatprep.subr.bf16.mxu0 %v1780_v41 }
 0x3b7   : > { %1659 = vmatprep.mubr.bf16.mxu0 %v915_v39 }
 0x3b8   : > { %1660 = vmatmul.mubr.bf16.gmra.mrb[44].mxu0 %v916_v40 }
 0x3b9   : > { %1676 = vmatpush3.bf16.msra.mxu0 %v1780_v41 }
 0x3ba   : > { %1677 = vmatprep.subr.bf16.mxu0 %v1781_v42 }
 0x3bd   : > { %1678 = vmatpush3.bf16.msra.mxu0 %v1781_v42 }
 0x473   : > { %v1649_v43 = vpop.f32.mrb[32].mxu0 }
 0x474   : > { %v1016_v44 = vpop.f32.mrb[33].mxu0 }
 0x475   : > { %v1650_v45 = vpop.f32.mrb[34].mxu0 }
 0x476   : > { %v1080_v46 = vpack.c.bf16 %v1650_v45, %v1649_v43  ;;  %v1019_v47 = vpop.f32.mrb[35].mxu0 }
 0x477   : > { %v1079_v48 = vpack.c.bf16 %v1019_v47, %v1016_v44 }
 0x478   : > { %v1088_v50 = vmax.bf16 %v1825_v61, %v1080_v46 }
 0x479   : > { %v1087_v49 = vmax.bf16 %v1825_v61, %v1079_v48 }
 0x47b   : > { %v1653_v51 = vpop.f32.mrb[36].mxu0  ;;  %1679 = vmatprep.mubr.bf16.mxu0 %v1087_v49 }
 0x47c   : > { %v1032_v52 = vpop.f32.mrb[37].mxu0  ;;  %1680 = vmatmul.mubr.bf16.vlgmr.msra.gmra.mrb[48].mxu0 %v1088_v50 }
 0x47d   : > { %v1654_v53 = vpop.f32.mrb[38].mxu0 }
 0x47e   : > { %v1082_v54 = vpack.c.bf16 %v1654_v53, %v1653_v51  ;;  %v1035_v55 = vpop.f32.mrb[39].mxu0 }
 0x47f   : > { %v1081_v56 = vpack.c.bf16 %v1035_v55, %v1032_v52 }
 0x480   : > { %v1090_v58 = vmax.bf16 %v1825_v61, %v1082_v54 }
 0x481   : > { %v1089_v57 = vmax.bf16 %v1825_v61, %v1081_v56 }
 0x483   : > { %v1657_v59 = vpop.f32.mrb[40].mxu0  ;;  %1683 = vmatprep.mubr.bf16.mxu1 %v1089_v57 }
 0x484   : > { %v1048_v60 = vpop.f32.mrb[41].mxu0  ;;  %1684 = vmatmul.mubr.bf16.vlgmr.msra.gmra.mrb[32].mxu1 %v1090_v58 }
 0x485   : > { %v1658_v62 = vpop.f32.mrb[42].mxu0 }
 0x486   : > { %v1084_v63 = vpack.c.bf16 %v1658_v62, %v1657_v59  ;;  %v1051_v0 = vpop.f32.mrb[43].mxu0 }
 0x487   : > { %v1083_v1 = vpack.c.bf16 %v1051_v0, %v1048_v60 }
 0x488   : > { %v1092_v3 = vmax.bf16 %v1825_v61, %v1084_v63 }
 0x489   : > { %v1091_v2 = vmax.bf16 %v1825_v61, %v1083_v1 }
 0x48b   : > { %v1661_v4 = vpop.f32.mrb[44].mxu0  ;;  %1687 = vmatprep.mubr.bf16.mxu1 %v1091_v2 }
 0x48c   : > { %v1064_v5 = vpop.f32.mrb[45].mxu0  ;;  %1688 = vmatmul.mubr.bf16.gmra.mrb[36].mxu1 %v1092_v3 }
 0x48d   : > { %v1662_v6 = vpop.f32.mrb[46].mxu0 }
 0x48e   : > { %v1086_v7 = vpack.c.bf16 %v1662_v6, %v1661_v4  ;;  %v1067_v8 = vpop.f32.mrb[47].mxu0 }
 0x48f   : > { %v1085_v9 = vpack.c.bf16 %v1067_v8, %v1064_v5 }
 0x490   : > { %v1094_v11 = vmax.bf16 %v1825_v61, %v1086_v7 }
 0x491   : > { %v1093_v10 = vmax.bf16 %v1825_v61, %v1085_v9 }
 0x493   : > { %1691 = vmatprep.mubr.bf16.mxu1 %v1093_v10 }
 0x494   : > { %1692 = vmatmul.mubr.bf16.gmra.mrb[40].mxu1 %v1094_v11 }
 0x54f   : > { %v1681_v12 = vpop.f32.mrb[48].mxu0 }
 0x550   : > { %v1259_v13 = vmax.f32 %v1681_v12, 0.0  ;;  %v1194_v14 = vpop.f32.mrb[49].mxu0 }
 0x551   : > { %v1257_v15 = vmax.f32 %v1194_v14, 0.0  ;;  %v1682_v16 = vpop.f32.mrb[50].mxu0 }
 0x552   : > { %1276 = vst.msk [vmem:[%s1959_s15 + $0x10] sm:$0xff] %vm1273_vm1, %v1259_v13  ;;  %v1260_v61 = vmax.f32 %v1682_v16, 0.0  ;;  %v1197_v17 = vpop.f32.mrb[51].mxu0 }
 0x553   : > { %1274 = vst.msk [vmem:[%s1959_s15] sm:$0xff] %vm1273_vm1, %v1257_v15  ;;  %v1258_v18 = vmax.f32 %v1197_v17, 0.0 }
 0x554   : > { %1277 = vst.msk [vmem:[%s1959_s15 + $0x18] sm:$0xff] %vm1273_vm1, %v1260_v61 }
 0x555   : > { %1275 = vst.msk [vmem:[%s1959_s15 + $0x8] sm:$0xff] %vm1273_vm1, %v1258_v18 }
 0x557   : > { %v1685_v19 = vpop.f32.mrb[32].mxu1 }
 0x558   : > { %v1263_v20 = vmax.f32 %v1685_v19, 0.0  ;;  %v1210_v21 = vpop.f32.mrb[33].mxu1 }
 0x559   : > { %v1261_v22 = vmax.f32 %v1210_v21, 0.0  ;;  %v1686_v23 = vpop.f32.mrb[34].mxu1 }
 0x55a   : > { %1280 = vst.msk [vmem:[%s1959_s15 + $0x30] sm:$0xff] %vm1273_vm1, %v1263_v20  ;;  %v1264_v24 = vmax.f32 %v1686_v23, 0.0  ;;  %v1213_v25 = vpop.f32.mrb[35].mxu1 }
 0x55b   : > { %1278 = vst.msk [vmem:[%s1959_s15 + $0x20] sm:$0xff] %vm1273_vm1, %v1261_v22  ;;  %v1262_v26 = vmax.f32 %v1213_v25, 0.0 }
 0x55c   : > { %1281 = vst.msk [vmem:[%s1959_s15 + $0x38] sm:$0xff] %vm1273_vm1, %v1264_v24 }
 0x55d   : > { %1279 = vst.msk [vmem:[%s1959_s15 + $0x28] sm:$0xff] %vm1273_vm1, %v1262_v26 }
 0x55f   : > { %v1689_v27 = vpop.f32.mrb[36].mxu1 }
 0x560   : > { %v1267_v28 = vmax.f32 %v1689_v27, 0.0  ;;  %v1226_v29 = vpop.f32.mrb[37].mxu1 }
 0x561   : > { %v1265_v30 = vmax.f32 %v1226_v29, 0.0  ;;  %v1690_v31 = vpop.f32.mrb[38].mxu1 }
 0x562   : > { %1284 = vst.msk [vmem:[%s1959_s15 + $0x50] sm:$0xff] %vm1273_vm1, %v1267_v28  ;;  %v1268_v32 = vmax.f32 %v1690_v31, 0.0  ;;  %v1229_v33 = vpop.f32.mrb[39].mxu1 }
 0x563   : > { %1282 = vst.msk [vmem:[%s1959_s15 + $0x40] sm:$0xff] %vm1273_vm1, %v1265_v30  ;;  %v1266_v34 = vmax.f32 %v1229_v33, 0.0 }
 0x564   : > { %1285 = vst.msk [vmem:[%s1959_s15 + $0x58] sm:$0xff] %vm1273_vm1, %v1268_v32 }
 0x565   : > { %1283 = vst.msk [vmem:[%s1959_s15 + $0x48] sm:$0xff] %vm1273_vm1, %v1266_v34 }
 0x567   : > { %v1693_v35 = vpop.f32.mrb[40].mxu1 }
 0x568   : > { %v1271_v36 = vmax.f32 %v1693_v35, 0.0  ;;  %v1242_v37 = vpop.f32.mrb[41].mxu1 }
 0x569   : > { %v1269_v38 = vmax.f32 %v1242_v37, 0.0  ;;  %v1694_v39 = vpop.f32.mrb[42].mxu1 }
 0x56a   : > { %1288 = vst.msk [vmem:[%s1959_s15 + $0x70] sm:$0xff] %vm1273_vm1, %v1271_v36  ;;  %v1272_v40 = vmax.f32 %v1694_v39, 0.0  ;;  %v1245_v41 = vpop.f32.mrb[43].mxu1 }
 0x56b   : > { %1286 = vst.msk [vmem:[%s1959_s15 + $0x60] sm:$0xff] %vm1273_vm1, %v1269_v38  ;;  %v1270_v42 = vmax.f32 %v1245_v41, 0.0 }
 0x56c   : > { %1289 = vst.msk [vmem:[%s1959_s15 + $0x78] sm:$0xff] %vm1273_vm1, %v1272_v40 }
 0x56d   : > { %1287 = vst.msk [vmem:[%s1959_s15 + $0x68] sm:$0xff] %vm1273_vm1, %v1270_v42 }
 0x56e PF: > { %s14_s12 = sadd.s32 1, %s1820_s12  }
 0x56f   : > { %p11_p3 = scmp.ge.s32.totalorder %s14_s12, 4  }
 0x571   :  { %13 = sbr.rel (!%p11_p3) target bundleno = 1 (0x1), region = 71 }
 0x578   :  { %1312 = vsyncpa [#allocation3], 1 }
 0x579   :  { %1314 = vsyncpa [#allocation3 + $0x1], 1 }

</bundles_post_ra>
